<compile_context>
chip_gen: v6e
topology: v6e:2x2x1
jax: 0.10.0
libtpu: 0.0.40
codegen_flags: <defaults>
</compile_context>

<pallas_src>
import functools

import jax
import jax.numpy as jnp
from jax.experimental import pallas as pl
from jax.experimental.pallas import tpu as pltpu

TM_MAX = 1024    # max rows per grid step (per-step VMEM stays << 1 MiB)


def _round_up(a, m):
    return ((a + m - 1) // m) * m


# --------------------------------------------------------------------------
# Kernels
# --------------------------------------------------------------------------
def _mlp_kernel_hidden(x_ref, w_in_ref, w_hid_ref, b_hid_ref, w_out_ref,
                       b_out_ref, o_ref, *, n_hidden_layers, g_col, d_col):
    """One batch tile: y = g + d * MLP(x); g/d live in the input slab."""
    x = x_ref[...]
    # Input layer: bias is folded into w_in via the ones column of x.
    h = jnp.tanh(jnp.dot(x, w_in_ref[...], preferred_element_type=jnp.float32))
    # Hidden layers (static unroll; n_hidden_layers is a trace-time constant).
    for l in range(n_hidden_layers):
        h = jnp.tanh(jnp.dot(h, w_hid_ref[l],
                             preferred_element_type=jnp.float32)
                     + b_hid_ref[l])
    # Output layer (no activation) — narrow 8-lane result.
    y = (jnp.dot(h, w_out_ref[...], preferred_element_type=jnp.float32)
         + b_out_ref[...])
    # G / D columns broadcast across the 8 output lanes on the VPU.
    g = x[:, g_col:g_col + 1]
    d = x[:, d_col:d_col + 1]
    o_ref[...] = g + d * y


def _mlp_kernel_nohidden(x_ref, w_in_ref, w_out_ref, b_out_ref, o_ref,
                         *, g_col, d_col):
    x = x_ref[...]
    h = jnp.tanh(jnp.dot(x, w_in_ref[...], preferred_element_type=jnp.float32))
    y = (jnp.dot(h, w_out_ref[...], preferred_element_type=jnp.float32)
         + b_out_ref[...])
    g = x[:, g_col:g_col + 1]
    d = x[:, d_col:d_col + 1]
    o_ref[...] = g + d * y


# --------------------------------------------------------------------------
# Parameter init (matches nn.Linear default: U(-1/sqrt(fan_in), +))
# --------------------------------------------------------------------------
def init_params(key, n_input, n_hidden, n_layers, n_output):
    n_lin = n_layers + 1
    keys = jax.random.split(key, 2 * n_lin)

    def lin(kw, kb, fan_in, fan_out):
        bound = 1.0 / float(fan_in) ** 0.5
        w = jax.random.uniform(kw, (fan_in, fan_out), jnp.float32, -bound, bound)
        b = jax.random.uniform(kb, (fan_out,), jnp.float32, -bound, bound)
        return w, b

    w_in, b_in = lin(keys[0], keys[1], n_input, n_hidden)
    w_hid, b_hid = [], []
    for l in range(n_layers - 1):
        w, b = lin(keys[2 + 2 * l], keys[3 + 2 * l], n_hidden, n_hidden)
        w_hid.append(w)
        b_hid.append(b)
    w_out, b_out = lin(keys[-2], keys[-1], n_hidden, n_output)
    return {
        "w_in": w_in, "b_in": b_in,
        "w_hid": jnp.stack(w_hid, axis=0) if w_hid else
                 jnp.zeros((0, n_hidden, n_hidden), jnp.float32),
        "b_hid": jnp.stack(b_hid, axis=0) if b_hid else
                 jnp.zeros((0, n_hidden), jnp.float32),
        "w_out": w_out, "b_out": b_out,
    }


# --------------------------------------------------------------------------
# One-time parameter prep: all padding / folding happens here, off the hot path
# --------------------------------------------------------------------------
def prepare_params(params, n_input):
    w_in = jnp.asarray(params["w_in"], jnp.float32)
    b_in = jnp.asarray(params["b_in"], jnp.float32)
    w_hid = jnp.asarray(params["w_hid"], jnp.float32)
    b_hid = jnp.asarray(params["b_hid"], jnp.float32)
    w_out = jnp.asarray(params["w_out"], jnp.float32)
    b_out = jnp.asarray(params["b_out"], jnp.float32)

    assert w_in.shape[0] == n_input
    n_hidden = w_in.shape[1]
    n_output = w_out.shape[1]
    n_hidden_layers = w_hid.shape[0]

    hid = _round_up(n_hidden, 8)              # sublane-friendly hidden width
    nout_pad = _round_up(max(n_output, 8), 8)
    # Input-slab column layout: [x0, a0, t, (f)] | ones(bias) | G | D | 0-pad
    bias_col = n_input
    g_col = n_input + 1
    d_col = n_input + 2
    nin_pad = _round_up(n_input + 3, 8)

    w_in_p = jnp.zeros((nin_pad, hid), jnp.float32)
    w_in_p = w_in_p.at[:n_input, :n_hidden].set(w_in)
    w_in_p = w_in_p.at[bias_col, :n_hidden].set(b_in)   # bias folded in

    if n_hidden_layers > 0:
        w_hid_p = jnp.zeros((n_hidden_layers, hid, hid), jnp.float32)
        w_hid_p = w_hid_p.at[:, :n_hidden, :n_hidden].set(w_hid)
        b_hid_p = jnp.zeros((n_hidden_layers, 1, hid), jnp.float32)
        b_hid_p = b_hid_p.at[:, 0, :n_hidden].set(b_hid)
    else:
        w_hid_p = None
        b_hid_p = None

    w_out_p = jnp.zeros((hid, nout_pad), jnp.float32)
    w_out_p = w_out_p.at[:n_hidden, :n_output].set(w_out)
    b_out_p = jnp.zeros((1, nout_pad), jnp.float32)
    b_out_p = b_out_p.at[0, :n_output].set(b_out)

    meta = dict(n_input=n_input, n_hidden=n_hidden, hid=hid,
                n_output=n_output, nout_pad=nout_pad,
                n_hidden_layers=n_hidden_layers,
                nin_pad=nin_pad, bias_col=bias_col,
                g_col=g_col, d_col=d_col)
    return {"w_in": w_in_p, "w_hid": w_hid_p, "b_hid": b_hid_p,
            "w_out": w_out_p, "b_out": b_out_p, "meta": meta}


# --------------------------------------------------------------------------
# Forward (hot path): build input slab, one pallas_call, slice result
# --------------------------------------------------------------------------
def osa_pinn_forward(prep, x0, a0, t, f=None, G=0.0, D=1.0):
    meta = prep["meta"]
    n_input = meta["n_input"]
    nin_pad = meta["nin_pad"]
    nout_pad = meta["nout_pad"]
    hid = meta["hid"]
    n_hidden_layers = meta["n_hidden_layers"]
    n_output = meta["n_output"]
    g_col = meta["g_col"]
    d_col = meta["d_col"]

    cols = [x0.reshape(-1, 1), a0.reshape(-1, 1), t.reshape(-1, 1)]
    if f is not None:
        cols.append(f.reshape(-1, 1))
    assert len(cols) == n_input, (len(cols), n_input)
    N = cols[0].shape[0]

    def _col(v):
        # (N,), (N,1) or scalar — never an (N, N) broadcast.
        v = jnp.asarray(v, jnp.float32)
        if v.size == 1:
            return jnp.broadcast_to(v.reshape(()), (N, 1))
        return v.reshape(N, 1)

    ones = jnp.ones((N, 1), jnp.float32)
    slab = jnp.concatenate(
        [c.astype(jnp.float32) for c in cols] + [ones, _col(G), _col(D)],
        axis=1)                                           # (N, n_input + 3)

    # --- batch tiling: big tiles amortize the ~0.35us per-grid-step cost;
    #     split into >=2 tiles whenever N >= 16 rows so both v7x TCs get work.
    N8 = _round_up(N, 8)
    if N8 > 2 * TM_MAX:
        TM = TM_MAX
    elif N8 >= 16:
        TM = _round_up((N8 + 1) // 2, 8)
    else:
        TM = N8
    N_pad = _round_up(N8, TM)
    grid = (N_pad // TM,)

    x_p = jnp.pad(slab, ((0, N_pad - N), (0, nin_pad - slab.shape[1])))

    row_in = pl.BlockSpec((TM, nin_pad), lambda i: (i, 0))
    row_out = pl.BlockSpec((TM, nout_pad), lambda i: (i, 0))
    w_in_spec = pl.BlockSpec((nin_pad, hid), lambda i: (0, 0))
    w_out_spec = pl.BlockSpec((hid, nout_pad), lambda i: (0, 0))
    b_out_spec = pl.BlockSpec((1, nout_pad), lambda i: (0, 0))

    if n_hidden_layers > 0:
        Lh = n_hidden_layers
        kernel = functools.partial(_mlp_kernel_hidden,
                                   n_hidden_layers=n_hidden_layers,
                                   g_col=g_col, d_col=d_col)
        in_specs = [row_in, w_in_spec,
                    pl.BlockSpec((Lh, hid, hid), lambda i: (0, 0, 0)),
                    pl.BlockSpec((Lh, 1, hid), lambda i: (0, 0, 0)),
                    w_out_spec, b_out_spec]
        operands = [x_p, prep["w_in"], prep["w_hid"], prep["b_hid"],
                    prep["w_out"], prep["b_out"]]
    else:
        kernel = functools.partial(_mlp_kernel_nohidden,
                                   g_col=g_col, d_col=d_col)
        in_specs = [row_in, w_in_spec, w_out_spec, b_out_spec]
        operands = [x_p, prep["w_in"], prep["w_out"], prep["b_out"]]

    out_p = pl.pallas_call(
        kernel,
        out_shape=jax.ShapeDtypeStruct((N_pad, nout_pad), jnp.float32),
        grid_spec=pltpu.PrefetchScalarGridSpec(
            num_scalar_prefetch=0,
            grid=grid,
            in_specs=in_specs,
            out_specs=row_out,
        ),
        compiler_params=pltpu.CompilerParams(
            dimension_semantics=("parallel",)),
    )(*operands)

    return out_p[:N, :n_output]


# --------------------------------------------------------------------------
# Plain-JAX reference (correctness check)
# --------------------------------------------------------------------------
def _reference_forward(params, x0, a0, t, f=None, G=0.0, D=1.0):
    cols = [x0.reshape(-1, 1), a0.reshape(-1, 1), t.reshape(-1, 1)]
    if f is not None:
        cols.append(f.reshape(-1, 1))
    x = jnp.concatenate(cols, axis=1).astype(jnp.float32)
    h = jnp.tanh(x @ params["w_in"] + params["b_in"])
    for l in range(params["w_hid"].shape[0]):
        h = jnp.tanh(h @ params["w_hid"][l] + params["b_hid"][l])
    y = h @ params["w_out"] + params["b_out"]
    G = jnp.asarray(G, jnp.float32)
    D = jnp.asarray(D, jnp.float32)
    if G.size > 1:
        G = G.reshape(-1, 1)
    if D.size > 1:
        D = D.reshape(-1, 1)
    return G + D * y


if __name__ == "__main__":
    # Config consistent with the module: forcing present -> n_input = 4,
    # n_hidden = 32, n_layers = 3, n_output = 1.
    n_input, n_hidden, n_layers, n_output = 4, 32, 3, 1
    N = 200  # number of (x0, a0, t, f) samples

    key = jax.random.PRNGKey(0)
    kp, kx, ka, kt, kf, kg, kd = jax.random.split(key, 7)
    params = init_params(kp, n_input, n_hidden, n_layers, n_output)
    prep = prepare_params(params, n_input)        # one-time, off the hot path

    x0 = jax.random.normal(kx, (N,), jnp.float32)
    a0 = jax.random.normal(ka, (N,), jnp.float32)
    t = jax.random.uniform(kt, (N,), jnp.float32)
    f = jax.random.normal(kf, (N,), jnp.float32)

    # 1) scalar G / D (default path).
    y1 = jax.block_until_ready(
        osa_pinn_forward(prep, x0, a0, t, f, G=0.0, D=1.0))
    y1_ref = _reference_forward(params, x0, a0, t, f, G=0.0, D=1.0)
    assert y1.shape == (N, n_output), y1.shape
    assert jnp.allclose(y1, y1_ref, atol=1e-5, rtol=1e-5), \
        float(jnp.max(jnp.abs(y1 - y1_ref)))

    # 2) per-row G_col / D_col (as produced by set_colls_and_obs).
    G_col = jax.random.normal(kg, (N, 1), jnp.float32)
    D_col = (jax.random.uniform(kd, (N, 1), jnp.float32) > 0.1).astype(
        jnp.float32)
    y2 = jax.block_until_ready(
        osa_pinn_forward(prep, x0, a0, t, f, G=G_col, D=D_col))
    y2_ref = _reference_forward(params, x0, a0, t, f, G=G_col, D=D_col)
    assert y2.shape == (N, n_output), y2.shape
    assert jnp.allclose(y2, y2_ref, atol=1e-5, rtol=1e-5), \
        float(jnp.max(jnp.abs(y2 - y2_ref)))

    # TODO(synk): calc_residuals/loss_func use torch.autograd.grad w.r.t. the
    # inputs; in JAX those are jax.grad compositions around this forward, not
    # part of the forward hot path, so they are not implemented here.
    print("KERNEL_OK")
</pallas_src>

<mosaic_0001>
module attributes {stable_mosaic.version = 11 : i64} {
  func.func @_mlp_kernel_hidden(%arg0: i32, %arg1: memref<104x8xf32, #tpu.memory_space<vmem>>, %arg2: memref<8x32xf32, #tpu.memory_space<vmem>>, %arg3: memref<2x32x32xf32, #tpu.memory_space<vmem>>, %arg4: memref<2x1x32xf32, #tpu.memory_space<vmem>>, %arg5: memref<32x8xf32, #tpu.memory_space<vmem>>, %arg6: memref<1x8xf32, #tpu.memory_space<vmem>>, %arg7: memref<104x8xf32, #tpu.memory_space<vmem>>) attributes {dimension_semantics = [#tpu.dimension_semantics<parallel>], iteration_bounds = array<i64: 2>, scalar_prefetch = 0 : i64, scratch_operands = 0 : i64, tpu.core_type = #tpu.core_type<tc>, window_params = [{transform_indices = @transform_0, window_bounds = array<i64: 104, 8>}, {pipeline_mode = #tpu.pipeline_mode<synchronous>, transform_indices = @transform_1, window_bounds = array<i64: 8, 32>}, {pipeline_mode = #tpu.pipeline_mode<synchronous>, transform_indices = @transform_2, window_bounds = array<i64: 2, 32, 32>}, {pipeline_mode = #tpu.pipeline_mode<synchronous>, transform_indices = @transform_3, window_bounds = array<i64: 2, 1, 32>}, {pipeline_mode = #tpu.pipeline_mode<synchronous>, transform_indices = @transform_4, window_bounds = array<i64: 32, 8>}, {pipeline_mode = #tpu.pipeline_mode<synchronous>, transform_indices = @transform_5, window_bounds = array<i64: 1, 8>}, {transform_indices = @transform_6, window_bounds = array<i64: 104, 8>}]} {
    %c0 = arith.constant 0 : index
    %c0_0 = arith.constant 0 : index
    %0 = vector.load %arg1[%c0, %c0_0] : memref<104x8xf32, #tpu.memory_space<vmem>>, vector<104x8xf32>
    %c0_1 = arith.constant 0 : index
    %c0_2 = arith.constant 0 : index
    %1 = vector.load %arg2[%c0_1, %c0_2] : memref<8x32xf32, #tpu.memory_space<vmem>>, vector<8x32xf32>
    %cst = arith.constant dense<0.000000e+00> : vector<104x32xf32>
    %2 = tpu.matmul %0, %1, %cst {dimension_numbers = #tpu.dot_dimension_numbers<[1], [0], [0], [1], [0, 0, 1, 1], [], []>} : vector<104x8xf32>, vector<8x32xf32>, vector<104x32xf32> -> vector<104x32xf32>
    %3 = math.tanh %2 : vector<104x32xf32>
    %c0_3 = arith.constant 0 : index
    %c0_4 = arith.constant 0 : index
    %c0_5 = arith.constant 0 : index
    %4 = vector.load %arg3[%c0_3, %c0_4, %c0_5] : memref<2x32x32xf32, #tpu.memory_space<vmem>>, vector<1x32x32xf32>
    %5 = vector.shape_cast %4 : vector<1x32x32xf32> to vector<32x32xf32>
    %cst_6 = arith.constant dense<0.000000e+00> : vector<104x32xf32>
    %6 = tpu.matmul %3, %5, %cst_6 {dimension_numbers = #tpu.dot_dimension_numbers<[1], [0], [0], [1], [0, 0, 1, 1], [], []>} : vector<104x32xf32>, vector<32x32xf32>, vector<104x32xf32> -> vector<104x32xf32>
    %c0_7 = arith.constant 0 : index
    %c0_8 = arith.constant 0 : index
    %c0_9 = arith.constant 0 : index
    %7 = vector.load %arg4[%c0_7, %c0_8, %c0_9] : memref<2x1x32xf32, #tpu.memory_space<vmem>>, vector<1x1x32xf32>
    %8 = vector.shape_cast %7 : vector<1x1x32xf32> to vector<1x32xf32>
    %9 = vector.broadcast %8 : vector<1x32xf32> to vector<104x32xf32>
    %10 = arith.addf %6, %9 : vector<104x32xf32>
    %11 = math.tanh %10 : vector<104x32xf32>
    %c1 = arith.constant 1 : index
    %c0_10 = arith.constant 0 : index
    %c0_11 = arith.constant 0 : index
    %12 = vector.load %arg3[%c1, %c0_10, %c0_11] : memref<2x32x32xf32, #tpu.memory_space<vmem>>, vector<1x32x32xf32>
    %13 = vector.shape_cast %12 : vector<1x32x32xf32> to vector<32x32xf32>
    %cst_12 = arith.constant dense<0.000000e+00> : vector<104x32xf32>
    %14 = tpu.matmul %11, %13, %cst_12 {dimension_numbers = #tpu.dot_dimension_numbers<[1], [0], [0], [1], [0, 0, 1, 1], [], []>} : vector<104x32xf32>, vector<32x32xf32>, vector<104x32xf32> -> vector<104x32xf32>
    %c1_13 = arith.constant 1 : index
    %c0_14 = arith.constant 0 : index
    %c0_15 = arith.constant 0 : index
    %15 = vector.load %arg4[%c1_13, %c0_14, %c0_15] : memref<2x1x32xf32, #tpu.memory_space<vmem>>, vector<1x1x32xf32>
    %16 = vector.shape_cast %15 : vector<1x1x32xf32> to vector<1x32xf32>
    %17 = vector.broadcast %16 : vector<1x32xf32> to vector<104x32xf32>
    %18 = arith.addf %14, %17 : vector<104x32xf32>
    %19 = math.tanh %18 : vector<104x32xf32>
    %c0_16 = arith.constant 0 : index
    %c0_17 = arith.constant 0 : index
    %20 = vector.load %arg5[%c0_16, %c0_17] : memref<32x8xf32, #tpu.memory_space<vmem>>, vector<32x8xf32>
    %cst_18 = arith.constant dense<0.000000e+00> : vector<104x8xf32>
    %21 = tpu.matmul %19, %20, %cst_18 {dimension_numbers = #tpu.dot_dimension_numbers<[1], [0], [0], [1], [0, 0, 1, 1], [], []>} : vector<104x32xf32>, vector<32x8xf32>, vector<104x8xf32> -> vector<104x8xf32>
    %c0_19 = arith.constant 0 : index
    %c0_20 = arith.constant 0 : index
    %22 = vector.load %arg6[%c0_19, %c0_20] : memref<1x8xf32, #tpu.memory_space<vmem>>, vector<1x8xf32>
    %23 = vector.broadcast %22 : vector<1x8xf32> to vector<104x8xf32>
    %24 = arith.addf %21, %23 : vector<104x8xf32>
    %25 = vector.extract_strided_slice %0 {offsets = [0, 5], sizes = [104, 1], strides = [1, 1]} : vector<104x8xf32> to vector<104x1xf32>
    %26 = vector.extract_strided_slice %0 {offsets = [0, 6], sizes = [104, 1], strides = [1, 1]} : vector<104x8xf32> to vector<104x1xf32>
    %27 = vector.broadcast %26 : vector<104x1xf32> to vector<104x8xf32>
    %28 = arith.mulf %27, %24 : vector<104x8xf32>
    %29 = vector.broadcast %25 : vector<104x1xf32> to vector<104x8xf32>
    %30 = arith.addf %29, %28 : vector<104x8xf32>
    %c0_21 = arith.constant 0 : index
    %c0_22 = arith.constant 0 : index
    %31 = vector.load %arg7[%c0_21, %c0_22] : memref<104x8xf32, #tpu.memory_space<vmem>>, vector<104x8xf32>
    tpu.vector_store %arg7[%c0_21, %c0_22], %30 {strides = array<i32>} : memref<104x8xf32, #tpu.memory_space<vmem>>, vector<104x8xf32>,
    return
  }
  func.func @transform_0(%arg0: i32) -> (i32, i32) {
    %c0_i32 = arith.constant 0 : i32
    %c0_i32_0 = arith.constant 0 : i32
    return %arg0, %c0_i32 : i32, i32
  }
  func.func @transform_1(%arg0: i32) -> (i32, i32) {
    %c0_i32 = arith.constant 0 : i32
    %c0_i32_0 = arith.constant 0 : i32
    %c0_i32_1 = arith.constant 0 : i32
    return %c0_i32, %c0_i32_0 : i32, i32
  }
  func.func @transform_2(%arg0: i32) -> (i32, i32, i32) {
    %c0_i32 = arith.constant 0 : i32
    %c0_i32_0 = arith.constant 0 : i32
    %c0_i32_1 = arith.constant 0 : i32
    %c0_i32_2 = arith.constant 0 : i32
    return %c0_i32, %c0_i32_0, %c0_i32_1 : i32, i32, i32
  }
  func.func @transform_3(%arg0: i32) -> (i32, i32, i32) {
    %c0_i32 = arith.constant 0 : i32
    %c0_i32_0 = arith.constant 0 : i32
    %c0_i32_1 = arith.constant 0 : i32
    %c0_i32_2 = arith.constant 0 : i32
    return %c0_i32, %c0_i32_0, %c0_i32_1 : i32, i32, i32
  }
  func.func @transform_4(%arg0: i32) -> (i32, i32) {
    %c0_i32 = arith.constant 0 : i32
    %c0_i32_0 = arith.constant 0 : i32
    %c0_i32_1 = arith.constant 0 : i32
    return %c0_i32, %c0_i32_0 : i32, i32
  }
  func.func @transform_5(%arg0: i32) -> (i32, i32) {
    %c0_i32 = arith.constant 0 : i32
    %c0_i32_0 = arith.constant 0 : i32
    %c0_i32_1 = arith.constant 0 : i32
    return %c0_i32, %c0_i32_0 : i32, i32
  }
  func.func @transform_6(%arg0: i32) -> (i32, i32) {
    %c0_i32 = arith.constant 0 : i32
    %c0_i32_0 = arith.constant 0 : i32
    return %arg0, %c0_i32 : i32, i32
  }
}

</mosaic_0001>

<bundles_post_ra>
// kernel: tpu_custom_call.1
= control target key start
LH: loop header
LB: loop body
LE: loop exit
PB: predicated region body
PF: predicated region fallthrough
CT: control target
= control target key end

     0   :  { %s1677_s21 = smov 0   ;;  %s2086_s0 = inlined_call_operand.vmem [shape: f32[208,8], index: 0, kind: input, shape index: {}]   ;;  %s2087_s1 = inlined_call_operand.vmem [shape: f32[8,32], index: 1, kind: input, shape index: {}]   ;;  %s2088_s2 = inlined_call_operand.vmem [shape: f32[2,32,32], index: 2, kind: input, shape index: {}]   ;;  %s2089_s3 = inlined_call_operand.vmem [shape: f32[2,1,32], index: 3, kind: input, shape index: {}]   ;;  %s2090_s4 = inlined_call_operand.vmem [shape: f32[32,8], index: 4, kind: input, shape index: {}]   ;;  %s2091_s5 = inlined_call_operand.vmem [shape: f32[1,8], index: 5, kind: input, shape index: {}]   ;;  %s2092_s6 = inlined_call_operand.vmem [shape: f32[208,8], index: 6, kind: output, shape index: {}]  }
   0x1 LB: > { %s1220_s22 = sadd.s32 4294967295, %s1636_s21   ;;  %p1224_p0 = scmp.ge.s32.totalorder %s1636_s21, 1  ;;  %s1636_s21 = sphi %s1677_s21, %s16_s21  }
   0x2   : > { %p213_p1 = scmp.lt.s32.totalorder %s1636_s21, 3 }
   0x4   : > { %p214_p2 = pnand %p1224_p0, %p213_p1 }
   0x5   : > { %s243_s25 = smul.u32 (!%p214_p2), 13, %s1220_s22 }
   0x6   : > { %217 = sbr.rel (%p214_p2) target bundleno = 888 (0x378), region = 44 }
   0x7   : > { %p244_p3 = scmp.lt.s32.totalorder (!%p214_p2), %s243_s25, 25 }
   0xb   : > { %v268_v0 = vld [vmem:[%s2087_s1] sm:$0xff]  ;;  %v1638_v1 = vmov 0.0   ;;  %vm1639_vm0 = vmmov 0   ;;  %s2094_s25 = smov (!%p244_p3, %s243_s25), 25  ;;  %vm269_vm1 = vcmask 64512   ;;  %v455_v15 = vld [vmem:[%s2088_s2 + $0x18] sm:$0xff] }
   0xc   : > { %1354 = vmatprep.subr.mxu0 %v1638_v1  ;;  %1356 = vmatprep.mubr.msk.f32.mxu0 %vm1639_vm0, %v1638_v1  ;;  %s1225_s26 = sshll.u32 %s2094_s25, 3  ;;  %v454_v16 = vld [vmem:[%s2088_s2 + $0x10] sm:$0xff]  ;;  %v453_v17 = vld [vmem:[%s2088_s2 + $0x8] sm:$0xff]  ;;  %v452_v18 = vld [vmem:[%s2088_s2] sm:$0xff]  ;;  %vm463_vm2 = vcmask 261120  }
   0xd   : > { %1355 = vmatpush3.msra.mxu0 %v268_v0  ;;  %1395 = vmatprep.subr.mxu1 %v1638_v1  ;;  %s1703_s29 = scalar_lea.vmem %s2086_s0, %s1225_s26  ;;  %v1257_v19 = vld [vmem:[%s2088_s2 + $0x38] sm:$0xff]  ;;  %v1256_v20 = vld [vmem:[%s2088_s2 + $0x30] sm:$0xff]  ;;  %v1255_v21 = vld [vmem:[%s2088_s2 + $0x28] sm:$0xff]  ;;  %s2038_s17 = scalar_lea.vmem %s2092_s6, %s1225_s26 }
   0xe   : > { %1403 = vmatprep.mubr.msk.f32.mxu1 %vm1639_vm0, %v1638_v1  ;;  %1442 = vmatprep.subr.mxu0 %v1638_v1  ;;  %v1706_v2 = vld [vmem:[%s1703_s29] sm:$0xff]  ;;  %v1713_v3 = vld [vmem:[%s1703_s29 + $0x8] sm:$0xff]  ;;  %v1720_v4 = vld [vmem:[%s1703_s29 + $0x10] sm:$0xff] }
   0xf   : > { %1357 = vmatmul.mubr.msk.f32.vlgmr.msra.gmra.mxu0 %vm269_vm1, %v1706_v2  ;;  %v1727_v5 = vld [vmem:[%s1703_s29 + $0x18] sm:$0xff]  ;;  %v1734_v6 = vld [vmem:[%s1703_s29 + $0x20] sm:$0xff]  ;;  %v1741_v7 = vld [vmem:[%s1703_s29 + $0x28] sm:$0xff]  ;;  %1396 = vmatpush3.msra.mxu1 %v455_v15 }
  0x10   : > { %1359 = vmatprep.mubr.msk.f32.mxu0 %vm1639_vm0, %v1638_v1  ;;  %v1748_v8 = vld [vmem:[%s1703_s29 + $0x30] sm:$0xff]  ;;  %v1755_v9 = vld [vmem:[%s1703_s29 + $0x38] sm:$0xff]  ;;  %v1762_v10 = vld [vmem:[%s1703_s29 + $0x40] sm:$0xff]  ;;  %1397 = vmatprep.subr.mxu1 %v1638_v1 }
  0x11   : > { %v1769_v11 = vld [vmem:[%s1703_s29 + $0x48] sm:$0xff]  ;;  %v1776_v12 = vld [vmem:[%s1703_s29 + $0x50] sm:$0xff]  ;;  %v1783_v13 = vld [vmem:[%s1703_s29 + $0x58] sm:$0xff]  ;;  %1398 = vmatpush3.msra.mxu1 %v454_v16  ;;  %1443 = vmatpush3.msra.mxu0 %v1257_v19 }
  0x12   : > { %v1790_v14 = vld [vmem:[%s1703_s29 + $0x60] sm:$0xff]  ;;  %1399 = vmatprep.subr.mxu1 %v1638_v1  ;;  %1444 = vmatprep.subr.mxu0 %v1638_v1  ;;  %v844_v62 = vld [vmem:[%s2090_s4 + $0x18] sm:$0xff]  ;;  %v843_v63 = vld [vmem:[%s2090_s4 + $0x10] sm:$0xff] }
  0x13   : > { %1360 = vmatmul.mubr.msk.f32.gmra.mxu0 %vm269_vm1, %v1713_v3  ;;  %1400 = vmatpush3.msra.mxu1 %v453_v17  ;;  %v1254_v61 = vld [vmem:[%s2088_s2 + $0x20] sm:$0xff]  ;;  %v842_v0 = vld [vmem:[%s2090_s4 + $0x8] sm:$0xff] }
  0x14   : > { %1362 = vmatprep.mubr.msk.f32.mxu0 %vm1639_vm0, %v1638_v1  ;;  %1401 = vmatprep.subr.mxu1 %v1638_v1  ;;  %v1881_v15 = vld [vmem:[%s2089_s3] ss:$0 sm:$0xff] }
  0x15   : > { %1402 = vmatpush3.msra.mxu1 %v452_v18  ;;  %1445 = vmatpush3.msra.mxu0 %v1256_v20 }
  0x16   : > { %1489 = vmatprep.subr.mxu1 %v1638_v1  ;;  %1446 = vmatprep.subr.mxu0 %v1638_v1 }
  0x17   : > { %1363 = vmatmul.mubr.msk.f32.gmra.mxu0 %vm269_vm1, %v1720_v4 }
  0x18   : > { %1365 = vmatprep.mubr.msk.f32.mxu0 %vm1639_vm0, %v1638_v1  ;;  %1447 = vmatpush3.msra.mxu0 %v1255_v21 }
  0x19   : > { %1448 = vmatprep.subr.mxu0 %v1638_v1 }
  0x1a   : > { %1449 = vmatpush3.msra.mxu0 %v1254_v61 }
  0x1b   : > { %1366 = vmatmul.mubr.msk.f32.gmra.mxu0 %vm269_vm1, %v1727_v5 }
  0x1c   : > { %1368 = vmatprep.mubr.msk.f32.mxu0 %vm1639_vm0, %v1638_v1 }
  0x1f   : > { %1369 = vmatmul.mubr.msk.f32.gmra.mxu0 %vm269_vm1, %v1734_v6 }
  0x20   : > { %1371 = vmatprep.mubr.msk.f32.mxu0 %vm1639_vm0, %v1638_v1 }
  0x23   : > { %1372 = vmatmul.mubr.msk.f32.gmra.mxu0 %vm269_vm1, %v1741_v7 }
  0x24   : > { %1374 = vmatprep.mubr.msk.f32.mxu0 %vm1639_vm0, %v1638_v1 }
  0x27   : > { %1375 = vmatmul.mubr.msk.f32.gmra.mxu0 %vm269_vm1, %v1748_v8 }
  0x28   : > { %1377 = vmatprep.mubr.msk.f32.mxu0 %vm1639_vm0, %v1638_v1 }
  0x2b   : > { %1378 = vmatmul.mubr.msk.f32.gmra.mxu0 %vm269_vm1, %v1755_v9 }
  0x2c   : > { %1380 = vmatprep.mubr.msk.f32.mxu0 %vm1639_vm0, %v1638_v1 }
  0x2f   : > { %1381 = vmatmul.mubr.msk.f32.gmra.mxu0 %vm269_vm1, %v1762_v10 }
  0x30   : > { %1383 = vmatprep.mubr.msk.f32.mxu0 %vm1639_vm0, %v1638_v1 }
  0x33   : > { %1384 = vmatmul.mubr.msk.f32.gmra.mxu0 %vm269_vm1, %v1769_v11 }
  0x34   : > { %1386 = vmatprep.mubr.msk.f32.mxu0 %vm1639_vm0, %v1638_v1 }
  0x37   : > { %1387 = vmatmul.mubr.msk.f32.gmra.mxu0 %vm269_vm1, %v1776_v12 }
  0x38   : > { %1389 = vmatprep.mubr.msk.f32.mxu0 %vm1639_vm0, %v1638_v1 }
  0x3b   : > { %1390 = vmatmul.mubr.msk.f32.gmra.mxu0 %vm269_vm1, %v1783_v13 }
  0x3c   : > { %1392 = vmatprep.mubr.msk.f32.mxu0 %vm1639_vm0, %v1638_v1 }
  0x3f   : > { %1393 = vmatmul.mubr.msk.f32.gmra.mxu0 %vm269_vm1, %v1790_v14 }
  0x40   : > { %1450 = vmatprep.mubr.msk.f32.mxu0 %vm1639_vm0, %v1638_v1 }
  0xcf   : > { %v375_v22 = vpop.f32.mrf.mxu0 }
  0xd0   : > { %1552 = vtanh.f32 %v375_v22 }
  0xd1   : > { %v1358_v23 = vpop.f32.mrf.mxu0 }
  0xd3   : > { %v380_v24 = vpop.f32.mrf.mxu0 }
  0xd4   : > { %1554 = vtanh.f32 %v380_v24 }
  0xd5   : > { %v1361_v25 = vpop.f32.mrf.mxu0 }
  0xd7   : > { %v385_v26 = vpop.f32.mrf.mxu0 }
  0xd8   : > { %1556 = vtanh.f32 %v385_v26 }
  0xd9   : > { %v1364_v27 = vpop.f32.mrf.mxu0 }
  0xdb   : > { %v390_v28 = vpop.f32.mrf.mxu0 }
  0xdc   : > { %1558 = vtanh.f32 %v390_v28 }
  0xdd   : > { %v1553_v29 = vpop.eup %1552  ;;  %v1367_v30 = vpop.f32.mrf.mxu0 }
  0xde   : > { %1404 = vmatmul.mubr.msk.f32.vlgmr.msra.gmra.mxu1 %vm463_vm2, %v1553_v29 }
  0xdf   : > { %v395_v31 = vpop.f32.mrf.mxu0  ;;  %1406 = vmatprep.mubr.msk.f32.mxu1 %vm1639_vm0, %v1638_v1  ;;  %1490 = vmatpush3.msra.mxu1 %v844_v62 }
  0xe0   : > { %1560 = vtanh.f32 %v395_v31  ;;  %1491 = vmatprep.subr.mxu1 %v1638_v1 }
  0xe1   : > { %v1555_v32 = vpop.eup %1554  ;;  %v1370_v33 = vpop.f32.mrf.mxu0  ;;  %1492 = vmatpush3.msra.mxu1 %v843_v63 }
  0xe2   : > { %1407 = vmatmul.mubr.msk.f32.gmra.mxu1 %vm463_vm2, %v1555_v32  ;;  %1493 = vmatprep.subr.mxu1 %v1638_v1 }
  0xe3   : > { %v400_v34 = vpop.f32.mrf.mxu0  ;;  %1409 = vmatprep.mubr.msk.f32.mxu1 %vm1639_vm0, %v1638_v1  ;;  %1494 = vmatpush3.msra.mxu1 %v842_v0 }
  0xe4   : > { %1562 = vtanh.f32 %v400_v34  ;;  %1495 = vmatprep.subr.mxu1 %v1638_v1 }
  0xe5   : > { %v1557_v35 = vpop.eup %1556  ;;  %v1373_v36 = vpop.f32.mrf.mxu0 }
  0xe6   : > { %1410 = vmatmul.mubr.msk.f32.gmra.mxu1 %vm463_vm2, %v1557_v35 }
  0xe7   : > { %v405_v37 = vpop.f32.mrf.mxu0  ;;  %1412 = vmatprep.mubr.msk.f32.mxu1 %vm1639_vm0, %v1638_v1 }
  0xe8   : > { %1564 = vtanh.f32 %v405_v37 }
  0xe9   : > { %v1559_v38 = vpop.eup %1558  ;;  %v1376_v39 = vpop.f32.mrf.mxu0 }
  0xea   : > { %1413 = vmatmul.mubr.msk.f32.gmra.mxu1 %vm463_vm2, %v1559_v38 }
  0xeb   : > { %v410_v40 = vpop.f32.mrf.mxu0  ;;  %1415 = vmatprep.mubr.msk.f32.mxu1 %vm1639_vm0, %v1638_v1 }
  0xec   : > { %1566 = vtanh.f32 %v410_v40 }
  0xed   : > { %v1561_v41 = vpop.eup %1560  ;;  %v1379_v42 = vpop.f32.mrf.mxu0 }
  0xee   : > { %1416 = vmatmul.mubr.msk.f32.gmra.mxu1 %vm463_vm2, %v1561_v41 }
  0xef   : > { %v415_v43 = vpop.f32.mrf.mxu0  ;;  %1418 = vmatprep.mubr.msk.f32.mxu1 %vm1639_vm0, %v1638_v1 }
  0xf0   : > { %1568 = vtanh.f32 %v415_v43 }
  0xf1   : > { %v1563_v44 = vpop.eup %1562  ;;  %v1382_v45 = vpop.f32.mrf.mxu0 }
  0xf2   : > { %1419 = vmatmul.mubr.msk.f32.gmra.mxu1 %vm463_vm2, %v1563_v44 }
  0xf3   : > { %v420_v46 = vpop.f32.mrf.mxu0  ;;  %1421 = vmatprep.mubr.msk.f32.mxu1 %vm1639_vm0, %v1638_v1 }
  0xf4   : > { %1570 = vtanh.f32 %v420_v46 }
  0xf5   : > { %v1565_v47 = vpop.eup %1564  ;;  %v1385_v48 = vpop.f32.mrf.mxu0 }
  0xf6   : > { %1422 = vmatmul.mubr.msk.f32.gmra.mxu1 %vm463_vm2, %v1565_v47 }
  0xf7   : > { %v425_v49 = vpop.f32.mrf.mxu0  ;;  %1424 = vmatprep.mubr.msk.f32.mxu1 %vm1639_vm0, %v1638_v1 }
  0xf8   : > { %1572 = vtanh.f32 %v425_v49 }
  0xf9   : > { %v1567_v50 = vpop.eup %1566  ;;  %v1388_v51 = vpop.f32.mrf.mxu0 }
  0xfa   : > { %1425 = vmatmul.mubr.msk.f32.gmra.mxu1 %vm463_vm2, %v1567_v50 }
  0xfb   : > { %v430_v52 = vpop.f32.mrf.mxu0  ;;  %1427 = vmatprep.mubr.msk.f32.mxu1 %vm1639_vm0, %v1638_v1 }
  0xfc   : > { %1574 = vtanh.f32 %v430_v52 }
  0xfd   : > { %v1569_v53 = vpop.eup %1568  ;;  %v1391_v54 = vpop.f32.mrf.mxu0 }
  0xfe   : > { %1428 = vmatmul.mubr.msk.f32.gmra.mxu1 %vm463_vm2, %v1569_v53 }
  0xff   : > { %v435_v55 = vpop.f32.mrf.mxu0  ;;  %1430 = vmatprep.mubr.msk.f32.mxu1 %vm1639_vm0, %v1638_v1 }
 0x100   : > { %1576 = vtanh.f32 %v435_v55 }
 0x101   : > { %v1571_v56 = vpop.eup %1570  ;;  %v1394_v57 = vpop.f32.mrf.mxu0 }
 0x102   : > { %1431 = vmatmul.mubr.msk.f32.gmra.mxu1 %vm463_vm2, %v1571_v56 }
 0x103   : > { %1433 = vmatprep.mubr.msk.f32.mxu1 %vm1639_vm0, %v1638_v1 }
 0x105   : > { %v1573_v58 = vpop.eup %1572 }
 0x106   : > { %1434 = vmatmul.mubr.msk.f32.gmra.mxu1 %vm463_vm2, %v1573_v58 }
 0x107   : > { %1436 = vmatprep.mubr.msk.f32.mxu1 %vm1639_vm0, %v1638_v1 }
 0x109   : > { %v1575_v59 = vpop.eup %1574 }
 0x10a   : > { %1437 = vmatmul.mubr.msk.f32.gmra.mxu1 %vm463_vm2, %v1575_v59 }
 0x10b   : > { %1439 = vmatprep.mubr.msk.f32.mxu1 %vm1639_vm0, %v1638_v1 }
 0x10d   : > { %v1577_v60 = vpop.eup %1576 }
 0x10e   : > { %1440 = vmatmul.mubr.msk.f32.gmra.mxu1 %vm463_vm2, %v1577_v60 }
 0x10f   : > { %1497 = vmatprep.mubr.msk.f32.mxu1 %vm1639_vm0, %v1638_v1 }
 0x19e   : > { %v569_v16 = vpop.f32.mrf.mxu1 }
 0x19f   : > { %v570_v17 = vadd.f32 %v1881_v15, %v569_v16 }
 0x1a0   : > { %v1405_v18 = vpop.f32.mrf.mxu1 }
 0x1a1   : > { %1578 = vtanh.f32 %v570_v17  ;;  %v841_v18 = vld [vmem:[%s2090_s4] sm:$0xff] }
 0x1a2   : > { %v574_v19 = vpop.f32.mrf.mxu1  ;;  %1496 = vmatpush3.msra.mxu1 %v841_v18 }
 0x1a3   : > { %v575_v20 = vadd.f32 %v1881_v15, %v574_v19  ;;  %v1640_v19 = vmov 6  }
 0x1a4   : > { %v1408_v21 = vpop.f32.mrf.mxu1  ;;  %1549 = vset.pattern.permute.xlu1 %v1640_v19  ;;  %1548 = vset.pattern.permute.xlu0 %v1640_v19 }
 0x1a5   : > { %1580 = vtanh.f32 %v575_v20  ;;  %1030 = vperm.xlu1 %1549, %v1720_v4   ;;  %1022 = vperm.xlu0 %1548, %v1706_v2   ;;  %v1641_v20 = vmov 5  }
 0x1a6   : > { %v579_v22 = vpop.f32.mrf.mxu1 }
 0x1a7   : > { %v580_v23 = vadd.f32 %v1881_v15, %v579_v22 }
 0x1a8   : > { %v1411_v24 = vpop.f32.mrf.mxu1 }
 0x1a9   : > { %1582 = vtanh.f32 %v580_v23  ;;  %1034 = vperm.xlu1 %1549, %v1727_v5   ;;  %1026 = vperm.xlu0 %1548, %v1713_v3  }
 0x1aa   : > { %v584_v25 = vpop.f32.mrf.mxu1 }
 0x1ab   : > { %v585_v26 = vadd.f32 %v1881_v15, %v584_v25 }
 0x1ac   : > { %v1414_v27 = vpop.f32.mrf.mxu1 }
 0x1ad   : > { %1584 = vtanh.f32 %v585_v26  ;;  %1042 = vperm.xlu1 %1549, %v1741_v7   ;;  %1038 = vperm.xlu0 %1548, %v1734_v6  }
 0x1ae   : > { %v1579_v28 = vpop.eup %1578  ;;  %v589_v29 = vpop.f32.mrf.mxu1 }
 0x1af   : > { %v590_v30 = vadd.f32 %v1881_v15, %v589_v29  ;;  %1451 = vmatmul.mubr.msk.f32.vlgmr.msra.gmra.mxu0 %vm463_vm2, %v1579_v28 }
 0x1b0   : > { %v1417_v31 = vpop.f32.mrf.mxu1  ;;  %1453 = vmatprep.mubr.msk.f32.mxu0 %vm1639_vm0, %v1638_v1 }
 0x1b1   : > { %1586 = vtanh.f32 %v590_v30  ;;  %1050 = vperm.xlu1 %1549, %v1755_v9   ;;  %1046 = vperm.xlu0 %1548, %v1748_v8  }
 0x1b2   : > { %v1581_v32 = vpop.eup %1580  ;;  %v594_v33 = vpop.f32.mrf.mxu1 }
 0x1b3   : > { %v595_v34 = vadd.f32 %v1881_v15, %v594_v33  ;;  %1454 = vmatmul.mubr.msk.f32.gmra.mxu0 %vm463_vm2, %v1581_v32 }
 0x1b4   : > { %v1420_v35 = vpop.f32.mrf.mxu1  ;;  %1456 = vmatprep.mubr.msk.f32.mxu0 %vm1639_vm0, %v1638_v1 }
 0x1b5   : > { %1588 = vtanh.f32 %v595_v34  ;;  %1058 = vperm.xlu1 %1549, %v1769_v11   ;;  %1054 = vperm.xlu0 %1548, %v1762_v10  }
 0x1b6   : > { %v1583_v36 = vpop.eup %1582  ;;  %v599_v37 = vpop.f32.mrf.mxu1 }
 0x1b7   : > { %v600_v38 = vadd.f32 %v1881_v15, %v599_v37  ;;  %1457 = vmatmul.mubr.msk.f32.gmra.mxu0 %vm463_vm2, %v1583_v36 }
 0x1b8   : > { %v1423_v39 = vpop.f32.mrf.mxu1  ;;  %1459 = vmatprep.mubr.msk.f32.mxu0 %vm1639_vm0, %v1638_v1 }
 0x1b9   : > { %1590 = vtanh.f32 %v600_v38  ;;  %1066 = vperm.xlu1 %1549, %v1783_v13   ;;  %1062 = vperm.xlu0 %1548, %v1776_v12  }
 0x1ba   : > { %v1585_v40 = vpop.eup %1584  ;;  %v604_v41 = vpop.f32.mrf.mxu1 }
 0x1bb   : > { %v605_v42 = vadd.f32 %v1881_v15, %v604_v41  ;;  %1460 = vmatmul.mubr.msk.f32.gmra.mxu0 %vm463_vm2, %v1585_v40 }
 0x1bc   : > { %v1426_v43 = vpop.f32.mrf.mxu1  ;;  %1462 = vmatprep.mubr.msk.f32.mxu0 %vm1639_vm0, %v1638_v1 }
 0x1bd   : > { %1592 = vtanh.f32 %v605_v42  ;;  %1550 = vset.pattern.permute.xlu1 %v1641_v20  ;;  %1070 = vperm.xlu0 %1548, %v1790_v14  }
 0x1be   : > { %v1587_v44 = vpop.eup %1586  ;;  %v609_v45 = vpop.f32.mrf.mxu1  ;;  %1087 = vperm.xlu1 %1550, %v1706_v2   ;;  %v1965_v2 = vld [vmem:[%s2089_s3 + $0x1] ss:$0 sm:$0xff] }
 0x1bf   : > { %v610_v46 = vadd.f32 %v1881_v15, %v609_v45  ;;  %1463 = vmatmul.mubr.msk.f32.gmra.mxu0 %vm463_vm2, %v1587_v44 }
 0x1c0   : > { %v1429_v47 = vpop.f32.mrf.mxu1  ;;  %1465 = vmatprep.mubr.msk.f32.mxu0 %vm1639_vm0, %v1638_v1 }
 0x1c1   : > { %1594 = vtanh.f32 %v610_v46  ;;  %1551 = vset.pattern.permute.xlu0 %v1641_v20 }
 0x1c2   : > { %v1589_v48 = vpop.eup %1588  ;;  %v614_v49 = vpop.f32.mrf.mxu1  ;;  %1095 = vperm.xlu1 %1550, %v1720_v4   ;;  %1091 = vperm.xlu0 %1551, %v1713_v3  }
 0x1c3   : > { %v615_v50 = vadd.f32 %v1881_v15, %v614_v49  ;;  %1466 = vmatmul.mubr.msk.f32.gmra.mxu0 %vm463_vm2, %v1589_v48 }
 0x1c4   : > { %v1432_v51 = vpop.f32.mrf.mxu1  ;;  %1468 = vmatprep.mubr.msk.f32.mxu0 %vm1639_vm0, %v1638_v1 }
 0x1c5   : > { %1596 = vtanh.f32 %v615_v50 }
 0x1c6   : > { %v1591_v52 = vpop.eup %1590  ;;  %v619_v53 = vpop.f32.mrf.mxu1  ;;  %1099 = vperm.xlu1 %1550, %v1727_v5   ;;  %1103 = vperm.xlu0 %1551, %v1734_v6  }
 0x1c7   : > { %v620_v54 = vadd.f32 %v1881_v15, %v619_v53  ;;  %1469 = vmatmul.mubr.msk.f32.gmra.mxu0 %vm463_vm2, %v1591_v52 }
 0x1c8   : > { %v1435_v55 = vpop.f32.mrf.mxu1  ;;  %1471 = vmatprep.mubr.msk.f32.mxu0 %vm1639_vm0, %v1638_v1 }
 0x1c9   : > { %1598 = vtanh.f32 %v620_v54 }
 0x1ca   : > { %v1593_v56 = vpop.eup %1592  ;;  %v624_v57 = vpop.f32.mrf.mxu1  ;;  %1107 = vperm.xlu1 %1550, %v1741_v7   ;;  %1111 = vperm.xlu0 %1551, %v1748_v8  }
 0x1cb   : > { %v625_v58 = vadd.f32 %v1881_v15, %v624_v57  ;;  %1472 = vmatmul.mubr.msk.f32.gmra.mxu0 %vm463_vm2, %v1593_v56 }
 0x1cc   : > { %v1438_v59 = vpop.f32.mrf.mxu1  ;;  %1474 = vmatprep.mubr.msk.f32.mxu0 %vm1639_vm0, %v1638_v1 }
 0x1cd   : > { %1600 = vtanh.f32 %v625_v58 }
 0x1ce   : > { %v1595_v60 = vpop.eup %1594  ;;  %v629_v61 = vpop.f32.mrf.mxu1  ;;  %1115 = vperm.xlu1 %1550, %v1755_v9   ;;  %1119 = vperm.xlu0 %1551, %v1762_v10  }
 0x1cf   : > { %v630_v62 = vadd.f32 %v1881_v15, %v629_v61  ;;  %1475 = vmatmul.mubr.msk.f32.gmra.mxu0 %vm463_vm2, %v1595_v60 }
 0x1d0   : > { %v1441_v63 = vpop.f32.mrf.mxu1  ;;  %1477 = vmatprep.mubr.msk.f32.mxu0 %vm1639_vm0, %v1638_v1 }
 0x1d1   : > { %1602 = vtanh.f32 %v630_v62 }
 0x1d2   : > { %v1597_v0 = vpop.eup %1596  ;;  %1123 = vperm.xlu1 %1550, %v1769_v11   ;;  %1127 = vperm.xlu0 %1551, %v1776_v12  }
 0x1d3   : > { %1478 = vmatmul.mubr.msk.f32.gmra.mxu0 %vm463_vm2, %v1597_v0 }
 0x1d4   : > { %1480 = vmatprep.mubr.msk.f32.mxu0 %vm1639_vm0, %v1638_v1 }
 0x1d6   : > { %v1599_v16 = vpop.eup %1598  ;;  %1131 = vperm.xlu1 %1550, %v1783_v13   ;;  %1135 = vperm.xlu0 %1551, %v1790_v14  }
 0x1d7   : > { %1481 = vmatmul.mubr.msk.f32.gmra.mxu0 %vm463_vm2, %v1599_v16 }
 0x1d8   : > { %1483 = vmatprep.mubr.msk.f32.mxu0 %vm1639_vm0, %v1638_v1 }
 0x1da   : > { %v1601_v15 = vpop.eup %1600 }
 0x1db   : > { %1484 = vmatmul.mubr.msk.f32.gmra.mxu0 %vm463_vm2, %v1601_v15 }
 0x1dc   : > { %1486 = vmatprep.mubr.msk.f32.mxu0 %vm1639_vm0, %v1638_v1 }
 0x1de   : > { %v1603_v17 = vpop.eup %1602 }
 0x1df   : > { %1487 = vmatmul.mubr.msk.f32.gmra.mxu0 %vm463_vm2, %v1603_v17 }
 0x220   : > { %v1023_v61 = vpop.permute.xlu0 %1022  ;;  %v1031_v62 = vpop.permute.xlu1 %1030 }
 0x224   : > { %v1027_v63 = vpop.permute.xlu0 %1026  ;;  %v1035_v0 = vpop.permute.xlu1 %1034 }
 0x228   : > { %v1039_v16 = vpop.permute.xlu0 %1038  ;;  %v1043_v15 = vpop.permute.xlu1 %1042 }
 0x22c   : > { %v1047_v17 = vpop.permute.xlu0 %1046  ;;  %v1051_v18 = vpop.permute.xlu1 %1050 }
 0x230   : > { %v2017_v19 = vpop.permute.xlu0 %1054  ;;  %v2019_v20 = vpop.permute.xlu1 %1058 }
 0x26f   : > { %v764_v3 = vpop.f32.mrf.mxu0 }
 0x270   : > { %v765_v4 = vadd.f32 %v1965_v2, %v764_v3  ;;  %v2023_v3 = vpop.permute.xlu1 %1066 }
 0x271   : > { %v1452_v5 = vpop.f32.mrf.mxu0 }
 0x272   : > { %1604 = vtanh.f32 %v765_v4 }
 0x273   : > { %v769_v6 = vpop.f32.mrf.mxu0 }
 0x274   : > { %v770_v7 = vadd.f32 %v1965_v2, %v769_v6 }
 0x275   : > { %v1455_v8 = vpop.f32.mrf.mxu0 }
 0x276   : > { %1606 = vtanh.f32 %v770_v7  ;;  %v1088_v8 = vpop.permute.xlu1 %1087 }
 0x277   : > { %v774_v9 = vpop.f32.mrf.mxu0 }
 0x278   : > { %v775_v10 = vadd.f32 %v1965_v2, %v774_v9 }
 0x279   : > { %v1458_v11 = vpop.f32.mrf.mxu0 }
 0x27a   : > { %1608 = vtanh.f32 %v775_v10 }
 0x27b   : > { %v779_v12 = vpop.f32.mrf.mxu0 }
 0x27c   : > { %v780_v13 = vadd.f32 %v1965_v2, %v779_v12 }
 0x27d   : > { %v1461_v14 = vpop.f32.mrf.mxu0 }
 0x27e   : > { %1610 = vtanh.f32 %v780_v13 }
 0x27f   : > { %v1605_v21 = vpop.eup %1604  ;;  %v784_v22 = vpop.f32.mrf.mxu0 }
 0x280   : > { %v785_v23 = vadd.f32 %v1965_v2, %v784_v22  ;;  %1498 = vmatmul.mubr.msk.f32.vlgmr.msra.gmra.mxu1 %vm463_vm2, %v1605_v21 }
 0x281   : > { %v1464_v24 = vpop.f32.mrf.mxu0  ;;  %1500 = vmatprep.mubr.msk.f32.mxu1 %vm1639_vm0, %v1638_v1 }
 0x282   : > { %1612 = vtanh.f32 %v785_v23 }
 0x283   : > { %v1607_v25 = vpop.eup %1606  ;;  %v789_v26 = vpop.f32.mrf.mxu0 }
 0x284   : > { %v790_v27 = vadd.f32 %v1965_v2, %v789_v26  ;;  %1501 = vmatmul.mubr.msk.f32.gmra.mxu1 %vm463_vm2, %v1607_v25  ;;  %v1096_v25 = vpop.permute.xlu1 %1095 }
 0x285   : > { %v1467_v28 = vpop.f32.mrf.mxu0  ;;  %1503 = vmatprep.mubr.msk.f32.mxu1 %vm1639_vm0, %v1638_v1 }
 0x286   : > { %1614 = vtanh.f32 %v790_v27 }
 0x287   : > { %v1609_v29 = vpop.eup %1608  ;;  %v794_v30 = vpop.f32.mrf.mxu0 }
 0x288   : > { %v795_v31 = vadd.f32 %v1965_v2, %v794_v30  ;;  %1504 = vmatmul.mubr.msk.f32.gmra.mxu1 %vm463_vm2, %v1609_v29 }
 0x289   : > { %v1470_v32 = vpop.f32.mrf.mxu0  ;;  %1506 = vmatprep.mubr.msk.f32.mxu1 %vm1639_vm0, %v1638_v1 }
 0x28a   : > { %1616 = vtanh.f32 %v795_v31 }
 0x28b   : > { %v1611_v33 = vpop.eup %1610  ;;  %v799_v34 = vpop.f32.mrf.mxu0 }
 0x28c   : > { %v800_v35 = vadd.f32 %v1965_v2, %v799_v34  ;;  %1507 = vmatmul.mubr.msk.f32.gmra.mxu1 %vm463_vm2, %v1611_v33  ;;  %v1100_v33 = vpop.permute.xlu1 %1099 }
 0x28d   : > { %v1473_v36 = vpop.f32.mrf.mxu0  ;;  %1509 = vmatprep.mubr.msk.f32.mxu1 %vm1639_vm0, %v1638_v1 }
 0x28e   : > { %1618 = vtanh.f32 %v800_v35 }
 0x28f   : > { %v1613_v37 = vpop.eup %1612  ;;  %v804_v38 = vpop.f32.mrf.mxu0 }
 0x290   : > { %v805_v39 = vadd.f32 %v1965_v2, %v804_v38  ;;  %1510 = vmatmul.mubr.msk.f32.gmra.mxu1 %vm463_vm2, %v1613_v37 }
 0x291   : > { %v1476_v40 = vpop.f32.mrf.mxu0  ;;  %1512 = vmatprep.mubr.msk.f32.mxu1 %vm1639_vm0, %v1638_v1 }
 0x292   : > { %1620 = vtanh.f32 %v805_v39 }
 0x293   : > { %v1615_v41 = vpop.eup %1614  ;;  %v809_v42 = vpop.f32.mrf.mxu0 }
 0x294   : > { %v810_v43 = vadd.f32 %v1965_v2, %v809_v42  ;;  %1513 = vmatmul.mubr.msk.f32.gmra.mxu1 %vm463_vm2, %v1615_v41 }
 0x295   : > { %v1479_v44 = vpop.f32.mrf.mxu0  ;;  %1515 = vmatprep.mubr.msk.f32.mxu1 %vm1639_vm0, %v1638_v1 }
 0x296   : > { %1622 = vtanh.f32 %v810_v43 }
 0x297   : > { %v1617_v45 = vpop.eup %1616  ;;  %v814_v46 = vpop.f32.mrf.mxu0 }
 0x298   : > { %v815_v47 = vadd.f32 %v1965_v2, %v814_v46  ;;  %1516 = vmatmul.mubr.msk.f32.gmra.mxu1 %vm463_vm2, %v1617_v45  ;;  %v1108_v45 = vpop.permute.xlu1 %1107 }
 0x299   : > { %v1482_v48 = vpop.f32.mrf.mxu0  ;;  %1518 = vmatprep.mubr.msk.f32.mxu1 %vm1639_vm0, %v1638_v1 }
 0x29a   : > { %1624 = vtanh.f32 %v815_v47 }
 0x29b   : > { %v1619_v49 = vpop.eup %1618  ;;  %v819_v50 = vpop.f32.mrf.mxu0 }
 0x29c   : > { %v820_v51 = vadd.f32 %v1965_v2, %v819_v50  ;;  %1519 = vmatmul.mubr.msk.f32.gmra.mxu1 %vm463_vm2, %v1619_v49 }
 0x29d   : > { %v1485_v52 = vpop.f32.mrf.mxu0  ;;  %1521 = vmatprep.mubr.msk.f32.mxu1 %vm1639_vm0, %v1638_v1 }
 0x29e   : > { %1626 = vtanh.f32 %v820_v51 }
 0x29f   : > { %v1621_v53 = vpop.eup %1620  ;;  %v824_v54 = vpop.f32.mrf.mxu0 }
 0x2a0   : > { %v825_v55 = vadd.f32 %v1965_v2, %v824_v54  ;;  %1522 = vmatmul.mubr.msk.f32.gmra.mxu1 %vm463_vm2, %v1621_v53  ;;  %v2021_v2 = vpop.permute.xlu0 %1062 }
 0x2a1   : > { %v1488_v56 = vpop.f32.mrf.mxu0  ;;  %1524 = vmatprep.mubr.msk.f32.mxu1 %vm1639_vm0, %v1638_v1 }
 0x2a2   : > { %1628 = vtanh.f32 %v825_v55 }
 0x2a3   : > { %v1623_v57 = vpop.eup %1622 }
 0x2a4   : > { %1525 = vmatmul.mubr.msk.f32.gmra.mxu1 %vm463_vm2, %v1623_v57  ;;  %v2030_v5 = vpop.permute.xlu0 %1070  ;;  %v1116_v57 = vpop.permute.xlu1 %1115 }
 0x2a5   : > { %1527 = vmatprep.mubr.msk.f32.mxu1 %vm1639_vm0, %v1638_v1 }
 0x2a7   : > { %v1625_v58 = vpop.eup %1624 }
 0x2a8   : > { %1528 = vmatmul.mubr.msk.f32.gmra.mxu1 %vm463_vm2, %v1625_v58  ;;  %v1092_v14 = vpop.permute.xlu0 %1091 }
 0x2a9   : > { %1530 = vmatprep.mubr.msk.f32.mxu1 %vm1639_vm0, %v1638_v1 }
 0x2ab   : > { %v1627_v59 = vpop.eup %1626 }
 0x2ac   : > { %1531 = vmatmul.mubr.msk.f32.gmra.mxu1 %vm463_vm2, %v1627_v59  ;;  %v1104_v39 = vpop.permute.xlu0 %1103 }
 0x2ad   : > { %1533 = vmatprep.mubr.msk.f32.mxu1 %vm1639_vm0, %v1638_v1  ;;  %v2028_v1 = vld [vmem:[%s2091_s5] ss:$0 sm:$0xff] }
 0x2af   : > { %v1629_v60 = vpop.eup %1628 }
 0x2b0   : > { %1534 = vmatmul.mubr.msk.f32.gmra.mxu1 %vm463_vm2, %v1629_v60  ;;  %v1112_v51 = vpop.permute.xlu0 %1111 }
 0x340   : > { %v957_v4 = vpop.f32.mrf.mxu1 }
 0x341   : > { %v958_v6 = vadd.f32 %v2028_v1, %v957_v4  ;;  %v1124_v4 = vpop.permute.xlu1 %1123 }
 0x342   : > { %v1499_v7 = vpop.f32.mrf.mxu1 }
 0x343   : > { %v1073_v9 = vmul.f32 %v1023_v61, %v958_v6 }
 0x344   : > { %v962_v10 = vpop.f32.mrf.mxu1 }
 0x345   : > { %v1138_v11 = vadd.f32 %v1088_v8, %v1073_v9  ;;  %v963_v12 = vadd.f32 %v2028_v1, %v962_v10 }
 0x346   : > { %v1502_v13 = vpop.f32.mrf.mxu1 }
 0x347   : > { %1151 = vst.msk [vmem:[%s2038_s17] sm:$0xff] %vm269_vm1, %v1138_v11  ;;  %v1074_v21 = vmul.f32 %v1027_v63, %v963_v12  ;;  %v1120_v63 = vpop.permute.xlu0 %1119 }
 0x348   : > { %v967_v22 = vpop.f32.mrf.mxu1 }
 0x349   : > { %v1139_v23 = vadd.f32 %v1092_v14, %v1074_v21  ;;  %v968_v24 = vadd.f32 %v2028_v1, %v967_v22  ;;  %v1132_v21 = vpop.permute.xlu1 %1131 }
 0x34a   : > { %v1505_v26 = vpop.f32.mrf.mxu1 }
 0x34b   : > { %1152 = vst.msk [vmem:[%s2038_s17 + $0x8] sm:$0xff] %vm269_vm1, %v1139_v23  ;;  %v1075_v27 = vmul.f32 %v1031_v62, %v968_v24  ;;  %v1128_v10 = vpop.permute.xlu0 %1127 }
 0x34c   : > { %v972_v28 = vpop.f32.mrf.mxu1 }
 0x34d   : > { %v1140_v29 = vadd.f32 %v1096_v25, %v1075_v27  ;;  %v973_v30 = vadd.f32 %v2028_v1, %v972_v28 }
 0x34e   : > { %v1508_v31 = vpop.f32.mrf.mxu1 }
 0x34f   : > { %1153 = vst.msk [vmem:[%s2038_s17 + $0x10] sm:$0xff] %vm269_vm1, %v1140_v29  ;;  %v1076_v32 = vmul.f32 %v1035_v0, %v973_v30  ;;  %v1136_v26 = vpop.permute.xlu0 %1135 }
 0x350   : > { %v977_v34 = vpop.f32.mrf.mxu1 }
 0x351   : > { %v1141_v35 = vadd.f32 %v1100_v33, %v1076_v32  ;;  %v978_v36 = vadd.f32 %v2028_v1, %v977_v34 }
 0x352   : > { %v1511_v37 = vpop.f32.mrf.mxu1 }
 0x353   : > { %1154 = vst.msk [vmem:[%s2038_s17 + $0x18] sm:$0xff] %vm269_vm1, %v1141_v35  ;;  %v1077_v38 = vmul.f32 %v1039_v16, %v978_v36 }
 0x354   : > { %v982_v40 = vpop.f32.mrf.mxu1 }
 0x355   : > { %v1142_v41 = vadd.f32 %v1104_v39, %v1077_v38  ;;  %v983_v42 = vadd.f32 %v2028_v1, %v982_v40 }
 0x356   : > { %v1514_v43 = vpop.f32.mrf.mxu1 }
 0x357   : > { %1155 = vst.msk [vmem:[%s2038_s17 + $0x20] sm:$0xff] %vm269_vm1, %v1142_v41  ;;  %v1078_v44 = vmul.f32 %v1043_v15, %v983_v42 }
 0x358   : > { %v987_v46 = vpop.f32.mrf.mxu1 }
 0x359   : > { %v1143_v47 = vadd.f32 %v1108_v45, %v1078_v44  ;;  %v988_v48 = vadd.f32 %v2028_v1, %v987_v46 }
 0x35a   : > { %v1517_v49 = vpop.f32.mrf.mxu1 }
 0x35b   : > { %1156 = vst.msk [vmem:[%s2038_s17 + $0x28] sm:$0xff] %vm269_vm1, %v1143_v47  ;;  %v1079_v50 = vmul.f32 %v1047_v17, %v988_v48 }
 0x35c   : > { %v992_v52 = vpop.f32.mrf.mxu1 }
 0x35d   : > { %v1144_v53 = vadd.f32 %v1112_v51, %v1079_v50  ;;  %v993_v54 = vadd.f32 %v2028_v1, %v992_v52 }
 0x35e   : > { %v1520_v55 = vpop.f32.mrf.mxu1 }
 0x35f   : > { %1157 = vst.msk [vmem:[%s2038_s17 + $0x30] sm:$0xff] %vm269_vm1, %v1144_v53  ;;  %v1080_v56 = vmul.f32 %v1051_v18, %v993_v54 }
 0x360   : > { %v997_v58 = vpop.f32.mrf.mxu1 }
 0x361   : > { %v1145_v59 = vadd.f32 %v1116_v57, %v1080_v56  ;;  %v998_v60 = vadd.f32 %v2028_v1, %v997_v58 }
 0x362   : > { %v1523_v61 = vpop.f32.mrf.mxu1 }
 0x363   : > { %1158 = vst.msk [vmem:[%s2038_s17 + $0x38] sm:$0xff] %vm269_vm1, %v1145_v59  ;;  %v1081_v62 = vmul.f32 %v2017_v19, %v998_v60 }
 0x364   : > { %v1002_v0 = vpop.f32.mrf.mxu1 }
 0x365   : > { %v1146_v16 = vadd.f32 %v1120_v63, %v1081_v62  ;;  %v1003_v15 = vadd.f32 %v2028_v1, %v1002_v0 }
 0x366   : > { %v1526_v17 = vpop.f32.mrf.mxu1 }
 0x367   : > { %1159 = vst.msk [vmem:[%s2038_s17 + $0x40] sm:$0xff] %vm269_vm1, %v1146_v16  ;;  %v1082_v18 = vmul.f32 %v2019_v20, %v1003_v15 }
 0x368   : > { %v1007_v6 = vpop.f32.mrf.mxu1 }
 0x369   : > { %v1147_v7 = vadd.f32 %v1124_v4, %v1082_v18  ;;  %v1008_v8 = vadd.f32 %v2028_v1, %v1007_v6 }
 0x36a   : > { %v1529_v9 = vpop.f32.mrf.mxu1 }
 0x36b   : > { %1160 = vst.msk [vmem:[%s2038_s17 + $0x48] sm:$0xff] %vm269_vm1, %v1147_v7  ;;  %v1083_v19 = vmul.f32 %v2021_v2, %v1008_v8 }
 0x36c   : > { %v1012_v11 = vpop.f32.mrf.mxu1 }
 0x36d   : > { %v1148_v12 = vadd.f32 %v1128_v10, %v1083_v19  ;;  %v1013_v13 = vadd.f32 %v2028_v1, %v1012_v11 }
 0x36e   : > { %v1532_v14 = vpop.f32.mrf.mxu1 }
 0x36f   : > { %1161 = vst.msk [vmem:[%s2038_s17 + $0x50] sm:$0xff] %vm269_vm1, %v1148_v12  ;;  %v1084_v20 = vmul.f32 %v2023_v3, %v1013_v13 }
 0x370   : > { %v1017_v22 = vpop.f32.mrf.mxu1 }
 0x371   : > { %v1149_v23 = vadd.f32 %v1132_v21, %v1084_v20  ;;  %v1018_v24 = vadd.f32 %v2028_v1, %v1017_v22 }
 0x372   : > { %v1535_v25 = vpop.f32.mrf.mxu1 }
 0x373   : > { %1162 = vst.msk [vmem:[%s2038_s17 + $0x58] sm:$0xff] %vm269_vm1, %v1149_v23  ;;  %v1085_v2 = vmul.f32 %v2030_v5, %v1018_v24 }
 0x375   : > { %v1150_v27 = vadd.f32 %v1136_v26, %v1085_v2 }
 0x377   : > { %1163 = vst.msk [vmem:[%s2038_s17 + $0x60] sm:$0xff] %vm269_vm1, %v1150_v27 }
 0x378 PF: > { %s16_s21 = sadd.s32 1, %s1636_s21  }
 0x379   : > { %p13_p4 = scmp.ge.s32.totalorder %s16_s21, 4  }
 0x37b   :  { %15 = sbr.rel (!%p13_p4) target bundleno = 1 (0x1), region = 76 }

</bundles_post_ra>
